<compile_context>
chip_gen: v6e
topology: v6e:2x2x1
jax: 0.10.0
libtpu: 0.0.40
codegen_flags: <defaults>
</compile_context>

<pallas_src>
import jax
import jax.numpy as jnp
from jax.experimental import pallas as pl
from jax.experimental.pallas import tpu as pltpu


# ----------------------------- helpers ------------------------------------ #
def _round_up(x, m):
    return (x + m - 1) // m * m


def _vmem_limit_bytes():
    """Generation-aware VMEM limit: physical capacity minus headroom."""
    try:
        cap = pltpu.get_tpu_info().vmem_capacity_bytes
    except Exception:
        cap = 64 * 1024 * 1024  # conservative (v7x-sized) fallback
    return max(cap - 16 * 1024 * 1024, 32 * 1024 * 1024)


def build_norm_adj(edge_index, num_nodes):
    """Dense symmetric-normalized adjacency with self-loops (PyG gcn_norm).

    A[i, j] counts edges j -> i; deg is the in-degree (incl. self-loop) of the
    target node, matching torch_geometric. Duplicate edges accumulate weight.
    """
    src = edge_index[0]
    dst = edge_index[1]
    loops = jnp.arange(num_nodes, dtype=edge_index.dtype)
    src = jnp.concatenate([src, loops])
    dst = jnp.concatenate([dst, loops])
    A = jnp.zeros((num_nodes, num_nodes), jnp.float32).at[dst, src].add(1.0)
    deg = A.sum(axis=1)
    dinv = jnp.where(deg > 0, jax.lax.rsqrt(deg), 0.0)
    return dinv[:, None] * A * dinv[None, :]


def init_gcn_params(key, n_layers, in_features, hidden_features, out_features):
    """Deterministic glorot-style weights, zero biases (PyG GCNConv shapes)."""
    dims = [in_features] + [hidden_features] * (n_layers - 1) + [out_features]
    params = []
    for i in range(n_layers):
        key, sub = jax.random.split(key)
        fan_in, fan_out = dims[i], dims[i + 1]
        scale = jnp.sqrt(6.0 / (fan_in + fan_out))
        w = jax.random.uniform(sub, (fan_in, fan_out), jnp.float32, -scale, scale)
        b = jnp.zeros((fan_out,), jnp.float32)
        params.append((w, b))
    return params


# ----------------------------- Pallas kernels ------------------------------ #
def gcn_hidden_kernel(a_hbm, x0_hbm, w_ref, b_ref, h_hbm, a_vmem, act_ref, sem):
    """Grid step l == hidden GCNConv layer l: act <- relu(A @ (act @ W_l) + b_l).

    a_hbm  : (Np, Np)  bf16  HBM (ANY); DMA'd once into a_vmem at layer 0
    x0_hbm : (Np, Fh)  bf16  HBM (ANY); DMA'd once into act_ref at layer 0
    w_ref  : (Fh, Fh)  bf16  this layer's padded weight (streamed)
    b_ref  : (1,  Fh)  f32   this layer's padded bias (streamed)
    h_hbm  : (Np, Fh)  bf16  HBM (ANY) output; written once at the last layer
    a_vmem : (Np, Np)  bf16  scratch — resident normalized adjacency
    act_ref: (Np, Fh)  bf16  scratch — persistent activations
    """
    l = pl.program_id(0)
    last = pl.num_programs(0) - 1

    # One-time loads: adjacency + input features (single-buffered, no pipeline).
    @pl.when(l == 0)
    def _():
        cp_a = pltpu.make_async_copy(a_hbm, a_vmem, sem.at[0])
        cp_x = pltpu.make_async_copy(x0_hbm, act_ref, sem.at[1])
        cp_a.start()
        cp_x.start()
        cp_a.wait()
        cp_x.wait()

    # Feature transform (bf16 MXU, f32 acc) then aggregation, bias, ReLU.
    h = jnp.dot(act_ref[...], w_ref[...], preferred_element_type=jnp.float32)
    agg = jnp.dot(a_vmem[...], h.astype(jnp.bfloat16),
                  preferred_element_type=jnp.float32)
    act_ref[...] = jnp.maximum(agg + b_ref[...], 0.0).astype(jnp.bfloat16)

    # Last hidden layer: write activations straight to the HBM output.
    @pl.when(l == last)
    def _():
        cp_o = pltpu.make_async_copy(act_ref, h_hbm, sem.at[0])
        cp_o.start()
        cp_o.wait()


def gcn_last_kernel(a_ref, h_ref, w_ref, b_ref, o_ref):
    """Final GCNConv (no ReLU), with its own narrow lane padding."""
    z = jnp.dot(h_ref[...], w_ref[...], preferred_element_type=jnp.float32)
    o_ref[...] = jnp.dot(a_ref[...], z.astype(jnp.bfloat16),
                         preferred_element_type=jnp.float32) + b_ref[...]


# ------------------------------- JAX glue ---------------------------------- #
def gcn_forward(x, edge_index, params):
    """GCN.forward (eval mode): fused hidden-layer call + narrow last-layer call."""
    N, Fin = x.shape
    L = len(params)
    hidden_dims = [w.shape[1] for w, _ in params[:-1]]
    Flast_in, Fout = params[-1][0].shape

    # Pad nodes and features to multiples of 128 (lane-dense, full MXU tiles).
    Np = _round_up(N, 128)
    Fh = _round_up(max([Fin, Flast_in, 128] + hidden_dims), 128)  # hidden width
    Fo = _round_up(max(Fout, 128), 128)                           # output width

    vmem_limit = _vmem_limit_bytes()

    a_hat = build_norm_adj(edge_index, N)
    a_pad = (jnp.zeros((Np, Np), jnp.float32)
             .at[:N, :N].set(a_hat).astype(jnp.bfloat16))
    x_pad = (jnp.zeros((Np, Fh), jnp.float32)
             .at[:N, :Fin].set(x).astype(jnp.bfloat16))

    if L >= 2:
        # Stacked, padded hidden-layer weights/biases (streamed per grid step).
        w_stack = jnp.zeros((L - 1, Fh, Fh), jnp.float32)
        b_stack = jnp.zeros((L - 1, 1, Fh), jnp.float32)
        for i, (w, b) in enumerate(params[:-1]):
            fi, fo = w.shape
            w_stack = w_stack.at[i, :fi, :fo].set(w)
            b_stack = b_stack.at[i, 0, :fo].set(b)
        w_stack = w_stack.astype(jnp.bfloat16)

        h_act = pl.pallas_call(
            gcn_hidden_kernel,
            out_shape=jax.ShapeDtypeStruct((Np, Fh), jnp.bfloat16),
            grid_spec=pltpu.PrefetchScalarGridSpec(
                num_scalar_prefetch=0,
                grid=(L - 1,),
                in_specs=[
                    pl.BlockSpec(memory_space=pl.ANY),                   # A_hat (HBM)
                    pl.BlockSpec(memory_space=pl.ANY),                   # X0    (HBM)
                    pl.BlockSpec((None, Fh, Fh), lambda l: (l, 0, 0)),   # W[l]
                    pl.BlockSpec((None, 1, Fh), lambda l: (l, 0, 0)),    # b[l]
                ],
                out_specs=pl.BlockSpec(memory_space=pl.ANY),             # hidden act
                scratch_shapes=[
                    pltpu.VMEM((Np, Np), jnp.bfloat16),   # resident A_hat (1 buffer)
                    pltpu.VMEM((Np, Fh), jnp.bfloat16),   # persistent activations
                    pltpu.SemaphoreType.DMA((2,)),
                ],
            ),
            compiler_params=pltpu.CompilerParams(
                dimension_semantics=("arbitrary",),       # layer axis is sequential
                vmem_limit_bytes=vmem_limit,
            ),
        )(a_pad, x_pad, w_stack, b_stack)
    else:
        h_act = x_pad

    # Last layer: padded only to its own (narrow) output width.
    w_last, b_last = params[-1]
    w_last_pad = (jnp.zeros((Fh, Fo), jnp.float32)
                  .at[:Flast_in, :Fout].set(w_last).astype(jnp.bfloat16))
    b_last_pad = jnp.zeros((1, Fo), jnp.float32).at[0, :Fout].set(b_last)

    out_padded = pl.pallas_call(
        gcn_last_kernel,
        out_shape=jax.ShapeDtypeStruct((Np, Fo), jnp.float32),
        compiler_params=pltpu.CompilerParams(vmem_limit_bytes=vmem_limit),
    )(a_pad, h_act, w_last_pad, b_last_pad)

    return out_padded[:N, :Fout]


def gcn_reference(x, a_hat, params):
    """Pure-JAX f32 reference (eval-mode GCN forward)."""
    h = x
    for w, b in params[:-1]:
        h = jnp.maximum(a_hat @ (h @ w) + b, 0.0)
    w, b = params[-1]
    return a_hat @ (h @ w) + b


# --------------------------------- main ------------------------------------ #
if __name__ == "__main__":
    key = jax.random.PRNGKey(0)

    n_layers = 3
    num_nodes = 16
    in_features = 8
    hidden_features = 32
    out_features = 16

    # Deterministic node features.
    key, kx, ke = jax.random.split(key, 3)
    x = jax.random.normal(kx, (num_nodes, in_features), jnp.float32)

    # Deterministic small graph: a ring plus a few random edges (shape [2, E]).
    ring_src = jnp.arange(num_nodes, dtype=jnp.int32)
    ring_dst = (ring_src + 1) % num_nodes
    rand_src = jax.random.randint(ke, (num_nodes,), 0, num_nodes, jnp.int32)
    rand_dst = jnp.flip(rand_src)
    edge_index = jnp.stack(
        [jnp.concatenate([ring_src, rand_src]),
         jnp.concatenate([ring_dst, rand_dst])],
        axis=0,
    )  # [2, 32]

    params = init_gcn_params(key, n_layers, in_features, hidden_features,
                             out_features)

    out = gcn_forward(x, edge_index, params)
    jax.block_until_ready(out)

    assert out.shape == (num_nodes, out_features)
    assert bool(jnp.isfinite(out).all())

    # Correctness vs. pure-JAX f32 reference (bf16 MXU -> loose tolerance).
    ref = gcn_reference(x, build_norm_adj(edge_index, num_nodes), params)
    assert bool(jnp.allclose(out, ref, atol=5e-2, rtol=5e-2))

    print("KERNEL_OK")
</pallas_src>

<mosaic_0001>
module attributes {stable_mosaic.version = 11 : i64} {
  func.func @gcn_hidden_kernel(%arg0: i32, %arg1: memref<128x128xbf16, #tpu.memory_space<any>>, %arg2: memref<128x128xbf16, #tpu.memory_space<any>>, %arg3: memref<1x128x128xbf16, #tpu.memory_space<vmem>>, %arg4: memref<1x1x128xf32, #tpu.memory_space<vmem>>, %arg5: memref<128x128xbf16, #tpu.memory_space<any>>, %arg6: memref<128x128xbf16, #tpu.memory_space<vmem>>, %arg7: memref<128x128xbf16, #tpu.memory_space<vmem>>, %arg8: memref<2x!tpu.dma_semaphore, #tpu.memory_space<semaphore_mem>>) attributes {dimension_semantics = [#tpu.dimension_semantics<arbitrary>], iteration_bounds = array<i64: 2>, scalar_prefetch = 0 : i64, scratch_operands = 3 : i64, tpu.core_type = #tpu.core_type<tc>, window_params = [{}, {}, {transform_indices = @transform_2, window_bounds = array<i64: 1, 128, 128>}, {transform_indices = @transform_3, window_bounds = array<i64: 1, 1, 128>}, {}]} {
    %c0_i32 = arith.constant 0 : i32
    %0 = arith.cmpi eq, %arg0, %c0_i32 : i32
    %1 = arith.extui %0 : i1 to i32
    %c0_i32_0 = arith.constant 0 : i32
    %2 = arith.cmpi ne, %1, %c0_i32_0 : i32
    scf.if %2 {
      %c0_i32_15 = arith.constant 0 : i32
      %21 = tpu.memref_slice %arg8[%c0_i32_15] : memref<2x!tpu.dma_semaphore, #tpu.memory_space<semaphore_mem>> -> memref<1x!tpu.dma_semaphore, #tpu.memory_space<semaphore_mem>>
      %22 = tpu.memref_squeeze %21 : memref<1x!tpu.dma_semaphore, #tpu.memory_space<semaphore_mem>> -> memref<!tpu.dma_semaphore, #tpu.memory_space<semaphore_mem>>
      tpu.enqueue_dma source(%arg1 : memref<128x128xbf16, #tpu.memory_space<any>>) target(%arg6 : memref<128x128xbf16, #tpu.memory_space<vmem>>) target_semaphore(%22 : memref<!tpu.dma_semaphore, #tpu.memory_space<semaphore_mem>>)
      %c1_i32_16 = arith.constant 1 : i32
      %23 = tpu.memref_slice %arg8[%c1_i32_16] : memref<2x!tpu.dma_semaphore, #tpu.memory_space<semaphore_mem>> -> memref<1x!tpu.dma_semaphore, #tpu.memory_space<semaphore_mem>>
      %24 = tpu.memref_squeeze %23 : memref<1x!tpu.dma_semaphore, #tpu.memory_space<semaphore_mem>> -> memref<!tpu.dma_semaphore, #tpu.memory_space<semaphore_mem>>
      tpu.enqueue_dma source(%arg2 : memref<128x128xbf16, #tpu.memory_space<any>>) target(%arg7 : memref<128x128xbf16, #tpu.memory_space<vmem>>) target_semaphore(%24 : memref<!tpu.dma_semaphore, #tpu.memory_space<semaphore_mem>>)
      %c0_i32_17 = arith.constant 0 : i32
      %25 = tpu.memref_slice %arg8[%c0_i32_17] : memref<2x!tpu.dma_semaphore, #tpu.memory_space<semaphore_mem>> -> memref<1x!tpu.dma_semaphore, #tpu.memory_space<semaphore_mem>>
      %26 = tpu.memref_squeeze %25 : memref<1x!tpu.dma_semaphore, #tpu.memory_space<semaphore_mem>> -> memref<!tpu.dma_semaphore, #tpu.memory_space<semaphore_mem>>
      tpu.wait_dma2 semaphore(%26 : memref<!tpu.dma_semaphore, #tpu.memory_space<semaphore_mem>>) src(%arg1 : memref<128x128xbf16, #tpu.memory_space<any>>) dst(%arg6 : memref<128x128xbf16, #tpu.memory_space<vmem>>)
      %c1_i32_18 = arith.constant 1 : i32
      %27 = tpu.memref_slice %arg8[%c1_i32_18] : memref<2x!tpu.dma_semaphore, #tpu.memory_space<semaphore_mem>> -> memref<1x!tpu.dma_semaphore, #tpu.memory_space<semaphore_mem>>
      %28 = tpu.memref_squeeze %27 : memref<1x!tpu.dma_semaphore, #tpu.memory_space<semaphore_mem>> -> memref<!tpu.dma_semaphore, #tpu.memory_space<semaphore_mem>>
      tpu.wait_dma2 semaphore(%28 : memref<!tpu.dma_semaphore, #tpu.memory_space<semaphore_mem>>) src(%arg2 : memref<128x128xbf16, #tpu.memory_space<any>>) dst(%arg7 : memref<128x128xbf16, #tpu.memory_space<vmem>>)
    } else {
    }
    %c0 = arith.constant 0 : index
    %c0_1 = arith.constant 0 : index
    %3 = vector.load %arg7[%c0, %c0_1] : memref<128x128xbf16, #tpu.memory_space<vmem>>, vector<128x128xbf16>
    %c0_2 = arith.constant 0 : index
    %c0_3 = arith.constant 0 : index
    %c0_4 = arith.constant 0 : index
    %4 = vector.load %arg3[%c0_2, %c0_3, %c0_4] : memref<1x128x128xbf16, #tpu.memory_space<vmem>>, vector<1x128x128xbf16>
    %5 = vector.shape_cast %4 : vector<1x128x128xbf16> to vector<128x128xbf16>
    %cst = arith.constant dense<0.000000e+00> : vector<128x128xf32>
    %6 = tpu.matmul %3, %5, %cst {dimension_numbers = #tpu.dot_dimension_numbers<[1], [0], [0], [1], [0, 0, 1, 1], [], []>} : vector<128x128xbf16>, vector<128x128xbf16>, vector<128x128xf32> -> vector<128x128xf32>
    %c0_5 = arith.constant 0 : index
    %c0_6 = arith.constant 0 : index
    %7 = vector.load %arg6[%c0_5, %c0_6] : memref<128x128xbf16, #tpu.memory_space<vmem>>, vector<128x128xbf16>
    %8 = arith.truncf %6 : vector<128x128xf32> to vector<128x128xbf16>
    %cst_7 = arith.constant dense<0.000000e+00> : vector<128x128xf32>
    %9 = tpu.matmul %7, %8, %cst_7 {dimension_numbers = #tpu.dot_dimension_numbers<[1], [0], [0], [1], [0, 0, 1, 1], [], []>} : vector<128x128xbf16>, vector<128x128xbf16>, vector<128x128xf32> -> vector<128x128xf32>
    %c0_8 = arith.constant 0 : index
    %c0_9 = arith.constant 0 : index
    %c0_10 = arith.constant 0 : index
    %10 = vector.load %arg4[%c0_8, %c0_9, %c0_10] : memref<1x1x128xf32, #tpu.memory_space<vmem>>, vector<1x1x128xf32>
    %11 = vector.shape_cast %10 : vector<1x1x128xf32> to vector<1x128xf32>
    %12 = vector.broadcast %11 : vector<1x128xf32> to vector<128x128xf32>
    %13 = arith.addf %9, %12 : vector<128x128xf32>
    %cst_11 = arith.constant 0.000000e+00 : f32
    %14 = vector.broadcast %cst_11 : f32 to vector<128x128xf32>
    %15 = arith.maximumf %13, %14 : vector<128x128xf32>
    %16 = arith.truncf %15 : vector<128x128xf32> to vector<128x128xbf16>
    %c0_12 = arith.constant 0 : index
    %c0_13 = arith.constant 0 : index
    %17 = vector.load %arg7[%c0_12, %c0_13] : memref<128x128xbf16, #tpu.memory_space<vmem>>, vector<128x128xbf16>
    tpu.vector_store %arg7[%c0_12, %c0_13], %16 {strides = array<i32>} : memref<128x128xbf16, #tpu.memory_space<vmem>>, vector<128x128xbf16>,
    %c1_i32 = arith.constant 1 : i32
    %18 = arith.cmpi eq, %arg0, %c1_i32 : i32
    %19 = arith.extui %18 : i1 to i32
    %c0_i32_14 = arith.constant 0 : i32
    %20 = arith.cmpi ne, %19, %c0_i32_14 : i32
    scf.if %20 {
      %c0_i32_15 = arith.constant 0 : i32
      %21 = tpu.memref_slice %arg8[%c0_i32_15] : memref<2x!tpu.dma_semaphore, #tpu.memory_space<semaphore_mem>> -> memref<1x!tpu.dma_semaphore, #tpu.memory_space<semaphore_mem>>
      %22 = tpu.memref_squeeze %21 : memref<1x!tpu.dma_semaphore, #tpu.memory_space<semaphore_mem>> -> memref<!tpu.dma_semaphore, #tpu.memory_space<semaphore_mem>>
      tpu.enqueue_dma source(%arg7 : memref<128x128xbf16, #tpu.memory_space<vmem>>) target(%arg5 : memref<128x128xbf16, #tpu.memory_space<any>>) target_semaphore(%22 : memref<!tpu.dma_semaphore, #tpu.memory_space<semaphore_mem>>)
      %c0_i32_16 = arith.constant 0 : i32
      %23 = tpu.memref_slice %arg8[%c0_i32_16] : memref<2x!tpu.dma_semaphore, #tpu.memory_space<semaphore_mem>> -> memref<1x!tpu.dma_semaphore, #tpu.memory_space<semaphore_mem>>
      %24 = tpu.memref_squeeze %23 : memref<1x!tpu.dma_semaphore, #tpu.memory_space<semaphore_mem>> -> memref<!tpu.dma_semaphore, #tpu.memory_space<semaphore_mem>>
      tpu.wait_dma2 semaphore(%24 : memref<!tpu.dma_semaphore, #tpu.memory_space<semaphore_mem>>) src(%arg7 : memref<128x128xbf16, #tpu.memory_space<vmem>>) dst(%arg5 : memref<128x128xbf16, #tpu.memory_space<any>>)
    } else {
    }
    return
  }
  func.func @transform_2(%arg0: i32) -> (i32, i32, i32) {
    %c0_i32 = arith.constant 0 : i32
    %c0_i32_0 = arith.constant 0 : i32
    %c0_i32_1 = arith.constant 0 : i32
    return %arg0, %c0_i32, %c0_i32_0 : i32, i32, i32
  }
  func.func @transform_3(%arg0: i32) -> (i32, i32, i32) {
    %c0_i32 = arith.constant 0 : i32
    %c0_i32_0 = arith.constant 0 : i32
    %c0_i32_1 = arith.constant 0 : i32
    return %arg0, %c0_i32, %c0_i32_0 : i32, i32, i32
  }
}

</mosaic_0001>

<bundles_post_ra>
// kernel: tpu_custom_call.1
= control target key start
LH: loop header
LB: loop body
LE: loop exit
PB: predicated region body
PF: predicated region fallthrough
CT: control target
= control target key end

     0   :  { %9 = vsyncpa [#allocation6], 0  ;;  %s1364_s0 = inlined_call_operand.hbm [shape: bf16[128,128], index: 0, kind: input, shape index: {}]   ;;  %s1365_s1 = inlined_call_operand.hbm [shape: bf16[128,128], index: 1, kind: input, shape index: {}]   ;;  %s1366_s2 = inlined_call_operand.hbm [shape: bf16[2,128,128], index: 2, kind: input, shape index: {}]   ;;  %s1367_s3 = inlined_call_operand.vmem [shape: f32[2,1,128], index: 3, kind: input, shape index: {}]   ;;  %s1368_s4 = inlined_call_operand.hbm [shape: bf16[128,128], index: 4, kind: output, shape index: {}]  }
   0x1   :  { %11 = vsyncpa [#allocation6 + $0x1], 0  ;;  %s1193_s15 = smov 0   ;;  %s1195_s16 = smov 0  }
   0x2   :  { %s1197_s17 = smov 0   ;;  %s1199_s18 = smov 0  }
   0x3 LB: > { %s1212_s19 = sadd.s32 4294967295, %s1161_s18   ;;  %s1215_s20 = sadd.s32 1, %s1161_s18   ;;  %s1161_s18 = sphi %s1199_s18, %s1386_s18   ;;  %s1157_s17 = sphi %s1197_s17, %s1385_s17   ;;  %s1153_s16 = sphi %s1195_s16, %s1384_s16   ;;  %s1149_s15 = sphi %s1193_s15, %s1383_s15  }
   0x4   : > { %s20_s21 = ssub.s32 %s1161_s18, %s1215_s20  ;;  %s23_s22 = sadd.s32 1, %s1157_s17 }
   0x5   : > { %p21_p0 = scmp.eq.s32.totalorder %s20_s21, 0  ;;  %p29_p1 = scmp.ne.s32.totalorder %s1157_s17, %s1153_s16 }
   0x6   : > { %p30_p2 = scmp.eq.s32.totalorder %s1161_s18, 0  ;;  %p36_p3 = scmp.ne.s32.totalorder %s1153_s16, %s1149_s15 }
   0x7   : > { %s1225_s23 = scalar_select %p21_p0, %s1157_s17, %s23_s22  }
   0x8   : > { %p31_p4 = por %p30_p2, %p29_p1  ;;  %p1369_p5 = scmp.eq.s32.totalorder %s1212_s19, 0 }
   0x9   : > { %p952_p6 = scmp.lt.s32.totalorder %s1161_s18, 2  ;;  %s70_s25 = sand.u32 1, %s1157_s17  }
   0xa   : > { %p1231_p7 = por %p1369_p5, %p36_p3  ;;  %s727_s26 = sshll.u32 %s70_s25, 6 }
   0xb   : > { %s778_s27 = sshll.u32 %s1161_s18, 10  ;;  %s74_s5 = scalar_lea.vmem [#allocation5], %s727_s26 }
   0xc   : > { %s1371_s24 = scalar_select %p1231_p7, 1, 0 }
   0xd   : > { %s1240_s30 = scalar_lea.hbm %s1366_s2, %s778_s27  ;;  %s81_s6 = sshll.u32 %s74_s5, 4  ;;  %s1242_s6 = int_to_ptr.vmem [resolvable:$true] %s81_s6 }
   0xe   : > { %p1244_p8 = pnand %p952_p6, %p31_p4  ;;  %s1248_s8 = scalar_lea.sflag [#allocation6], %s70_s25 }
   0xf   : > { %s1015_s9 = scalar_lea.hbm %s1240_s30, 1024  ;;  %s1020_s12 = scalar_lea.hbm %s1366_s2, 2048 }
  0x10   : > { %p1016_p9 = scmp.ne.s32.totalorder %s1240_s30, %s1015_s9  ;;  %p1017_p10 = pneg %p1244_p8 }
  0x11   : > { %p1021_p13 = scmp.lt.s32.totalorder %s1240_s30, %s1366_s2  ;;  %p1022_p0 = scmp.lt.s32.totalorder %s1020_s12, %s1015_s9 }
  0x12   : > { %p1018_p11 = pnand %p1017_p10, %p1016_p9 }
  0x13   : > { %p1023_p1 = por %p1022_p0, %p1021_p13 }
  0x14   : > { %p1019_p12 = pneg %p1018_p11 }
  0x16   : > { %p1024_p2 = pnand %p1023_p1, %p1019_p12 }
  0x18   : > { %1027 = shalt.err (!%p1024_p2)
}
  0x19   : > { %s1028_s15 = scalar_lea.vmem %s1242_s6, 1024  ;;  %s1163_s21 = smov [#allocation5]  }
  0x1a   : > { %p1029_p3 = scmp.ne.s32.totalorder %s1242_s6, %s1028_s15  ;;  %s1033_s22 = sshll.u32 %s1163_s21, 4  ;;  %s1034_s22 = int_to_ptr.vmem [resolvable:$false] %s1033_s22 }
  0x1b   : > { %s1035_s25 = scalar_lea.vmem %s1034_s22, 2048  ;;  %p1036_p9 = scmp.lt.s32.totalorder %s1242_s6, %s1034_s22 }
  0x1c   : > { %p1031_p4 = pnand %p1029_p3, %p1017_p10  ;;  %p1037_p11 = scmp.lt.s32.totalorder %s1035_s25, %s1028_s15 }
  0x1e   : > { %p1032_p6 = pneg %p1031_p4  ;;  %p1038_p5 = por %p1037_p11, %p1036_p9 }
  0x20   : > { %p1039_p7 = pnand %p1038_p5, %p1032_p6 }
  0x22   : > { %1042 = shalt.err (!%p1039_p7)
}
  0x23   : > { %s1164_s26 = smov 64   ;;  %s1165_s27 = smov 4  }
  0x24   : > { %951 = dma.hbm_to_vmem [thread:$0]  (!%p1244_p8), %s1240_s30, 1024, %s1242_s6, %s1248_s8, %s1164_s26, %s1164_s26, %s1165_s27  }
  0x25   : > { %p731_p10 = scmp.lt.s32.totalorder %s1161_s18, 1 }
  0x26   : > { %s99_s28 = sand.u32 (!%p731_p10), 1, %s1153_s16   ;;  %p1373_p5 = scmp.ne.s32.totalorder (!%p731_p10), %s1371_s24, 0 }
  0x27   : > { %97 = sbr.rel (%p731_p10) target bundleno = 602 (0x25a), region = 28  ;;  %s732_s29 = sshll.u32 (!%p731_p10), %s99_s28, 6 }
  0x28   : > { %s100_s5 = scalar_lea.sflag (!%p731_p10), [#allocation6], %s99_s28  ;;  %s1271_s9 = scalar_lea.vmem (!%p731_p10), [#allocation5], %s732_s29 }
  0x2c   : > { %1132 = dma.done.wait (%p1373_p5), %s100_s5, 1024  }
  0x2d   : > { %1134 = vsyncadd (%p1373_p5), %s100_s5, 4294966272  ;;  %p120_p7 = scmp.lt.s32.totalorder %s1212_s19, 1  ;;  %s1166_s18 = smov [#allocation2]  }
  0x2e   : > { %s135_s6 = sshll.u32 %s1166_s18, 4  ;;  %s1167_s7 = smov [#allocation3]   ;;  %s136_s6 = int_to_ptr.vmem [resolvable:$true] %s135_s6 }
  0x2f   : > { %s1279_s30 = scalar_select %p120_p7, %s1212_s19, 1 }
  0x30   : > { %s147_s8 = sshll.u32 %s1167_s7, 4  ;;  %s1053_s13 = scalar_lea.vmem %s136_s6, 1024  ;;  %s1292_s8 = int_to_ptr.vmem [resolvable:$true] %s147_s8 }
  0x31   : > { %s122_s12 = scalar_lea.vmem %s1367_s3, %s1279_s30  ;;  %p1054_p8 = scmp.ne.s32.totalorder %s136_s6, %s1053_s13 }
  0x32   : > { %p1374_p12 = scmp.eq.s32.totalorder %s1212_s19, 0  ;;  %p1060_p1 = scmp.lt.s32.totalorder %s136_s6, %s136_s6 }
  0x33   : > { %p1061_p2 = scmp.lt.s32.totalorder %s1053_s13, %s1053_s13 }
  0x34   : > { %p1055_p13 = pnand %p1054_p8, %p1374_p12 }
  0x35   : > { %p1062_p3 = por %p1061_p2, %p1060_p1 }
  0x36   : > { %p1056_p0 = pneg %p1055_p13 }
  0x38   : > { %p1063_p4 = pnand %p1062_p3, %p1056_p0 }
  0x3a   : > { %1066 = shalt.err (!%p1063_p4)  }
  0x3b   : > { %p1375_p6 = pmov %p1374_p12  ;;  %s1295_s15 = scalar_lea.vmem %s1292_s8, 1024 }
  0x3c   : > { %p1078_p9 = scmp.ne.s32.totalorder %s1292_s8, %s1295_s15  ;;  %p1084_p7 = scmp.lt.s32.totalorder %s1292_s8, %s1292_s8 }
  0x3d   : > { %941 = dma.hbm_to_vmem [thread:$0]  (%p1375_p6), %s1364_s0, 1024, %s136_s6, [#allocation4] }
  0x3e   : > { %p1376_p11 = pmov %p1375_p6  ;;  %p1085_p8 = scmp.lt.s32.totalorder %s1295_s15, %s1295_s15 }
  0x40   : > { %p1079_p10 = pnand %p1078_p9, %p1376_p11  ;;  %p1308_p12 = por %p1085_p8, %p1084_p7 }
  0x42   : > { %p1080_p5 = pneg %p1079_p10 }
  0x44   : > { %p1087_p13 = pnand %p1308_p12, %p1080_p5 }
  0x46   : > { %1090 = shalt.err (!%p1087_p13)  }
  0x47   : > { %p1378_p0 = pmov %p1375_p6 }
  0x49   : > { %942 = dma.hbm_to_vmem [thread:$0]  (%p1378_p0), %s1365_s1, 1024, %s1292_s8, [#allocation4 + $0x1] }
  0x4a   : > { %p1379_p1 = pmov %p1378_p0 }
  0x4b   : > { %p1380_p2 = pmov %p1378_p0 }
  0x4c   : > { %1136 = dma.done.wait (%p1379_p1), [#allocation4], 1024 }
  0x4d   : > { %1138 = vsyncadd (%p1380_p2), [#allocation4], 4294966272  ;;  %p1381_p3 = pmov %p1378_p0 }
  0x4e   : > { %p1382_p4 = pmov %p1378_p0 }
  0x4f   : > { %1140 = dma.done.wait (%p1381_p3), [#allocation4 + $0x1], 1024 }
  0x50   : > { %1142 = vsyncadd (%p1382_p4), [#allocation4 + $0x1], 4294966272  ;;  %v991_v0 = vld [vmem:[%s1271_s9 + $0x38] sm:$0xff]   ;;  %v992_v1 = vld [vmem:[%s1271_s9 + $0x30] sm:$0xff]   ;;  %p954_p6 = scmp.eq.s32.totalorder %s1212_s19, 1 }
  0x51   : > { %874 = vmatprep.subr.bf16.mxu0 %v991_v0  ;;  %v993_v2 = vld [vmem:[%s1271_s9 + $0x28] sm:$0xff]   ;;  %v994_v3 = vld [vmem:[%s1271_s9 + $0x20] sm:$0xff]   ;;  %v995_v5 = vld [vmem:[%s1271_s9 + $0x18] sm:$0xff]  }
  0x52   : > { %875 = vmatpush3.bf16.msra.mxu0 %v991_v0  ;;  %v999_v4 = vld [vmem:[#allocation3] sm:$0xff]   ;;  %v996_v6 = vld [vmem:[%s1271_s9 + $0x10] sm:$0xff]   ;;  %v997_v7 = vld [vmem:[%s1271_s9 + $0x8] sm:$0xff]   ;;  %p1093_p11 = pnand %p1078_p9, %p954_p6 }
  0x53   : > { %876 = vmatprep.subr.bf16.mxu0 %v992_v1  ;;  %890 = vmatprep.mubr.bf16.mxu0 %v999_v4  ;;  %v998_v8 = vld [vmem:[%s1271_s9] sm:$0xff]   ;;  %v1000_v9 = vld [vmem:[#allocation3 + $0x8] sm:$0xff]   ;;  %v1001_v10 = vld [vmem:[#allocation3 + $0x10] sm:$0xff]  }
  0x54   : > { %v1002_v11 = vld [vmem:[#allocation3 + $0x18] sm:$0xff]   ;;  %v1003_v12 = vld [vmem:[#allocation3 + $0x20] sm:$0xff]   ;;  %v1004_v13 = vld [vmem:[#allocation3 + $0x28] sm:$0xff]   ;;  %p1094_p10 = pneg %p1093_p11 }
  0x55   : > { %v1005_v14 = vld [vmem:[#allocation3 + $0x30] sm:$0xff]   ;;  %v1006_v15 = vld [vmem:[#allocation3 + $0x38] sm:$0xff]   ;;  %v1007_v16 = vld [vmem:[#allocation2] sm:$0xff]  }
  0x56   : > { %877 = vmatpush3.bf16.msra.mxu0 %v992_v1  ;;  %922 = vmatprep.mubr.bf16.mxu1 %v1007_v16  ;;  %v1008_v41 = vld [vmem:[#allocation2 + $0x8] sm:$0xff]   ;;  %v1009_v42 = vld [vmem:[#allocation2 + $0x10] sm:$0xff]   ;;  %v1010_v43 = vld [vmem:[#allocation2 + $0x18] sm:$0xff]   ;;  %p1101_p5 = pnand %p1094_p10, %p1308_p12 }
  0x57   : > { %878 = vmatprep.subr.bf16.mxu0 %v993_v2  ;;  %v1011_v44 = vld [vmem:[#allocation2 + $0x20] sm:$0xff]   ;;  %v1012_v45 = vld [vmem:[#allocation2 + $0x28] sm:$0xff]   ;;  %v1013_v46 = vld [vmem:[#allocation2 + $0x30] sm:$0xff]  }
  0x58   : > { %v1014_v47 = vld [vmem:[#allocation2 + $0x38] sm:$0xff]   ;;  %v750_v49 = vld [vmem:[%s122_s12] ss:$0 sm:$0xff] }
  0x5a   : > { %879 = vmatpush3.bf16.msra.mxu0 %v993_v2 }
  0x5b   : > { %880 = vmatprep.subr.bf16.mxu0 %v994_v3 }
  0x5e   : > { %881 = vmatpush3.bf16.msra.mxu0 %v994_v3 }
  0x5f   : > { %882 = vmatprep.subr.bf16.mxu0 %v995_v5 }
  0x62   : > { %883 = vmatpush3.bf16.msra.mxu0 %v995_v5 }
  0x63   : > { %884 = vmatprep.subr.bf16.mxu0 %v996_v6 }
  0x66   : > { %885 = vmatpush3.bf16.msra.mxu0 %v996_v6 }
  0x67   : > { %886 = vmatprep.subr.bf16.mxu0 %v997_v7 }
  0x6a   : > { %887 = vmatpush3.bf16.msra.mxu0 %v997_v7 }
  0x6b   : > { %888 = vmatprep.subr.bf16.mxu0 %v998_v8 }
  0x6e   : > { %889 = vmatpush3.bf16.msra.mxu0 %v998_v8 }
  0x71   : > { %891 = vmatmul.mubr.bf16.vlgmr.msra.gmra.mxu0 %v1000_v9 }
  0x72   : > { %894 = vmatprep.mubr.bf16.mxu0 %v1001_v10 }
  0x79   : > { %895 = vmatmul.mubr.bf16.gmra.mxu0 %v1002_v11 }
  0x7a   : > { %898 = vmatprep.mubr.bf16.mxu0 %v1003_v12 }
  0x81   : > { %899 = vmatmul.mubr.bf16.gmra.mxu0 %v1004_v13 }
  0x82   : > { %902 = vmatprep.mubr.bf16.mxu0 %v1005_v14 }
  0x89   : > { %903 = vmatmul.mubr.bf16.gmra.mxu0 %v1006_v15 }
 0x131   : > { %v892_v17 = vpop.f32.mrf.mxu0 }
 0x133   : > { %v319_v18 = vpop.f32.mrf.mxu0 }
 0x135   : > { %v893_v19 = vpop.f32.mrf.mxu0 }
 0x136   : > { %v399_v39 = vpack.c.bf16 %v893_v19, %v892_v17 }
 0x137   : > { %v322_v20 = vpop.f32.mrf.mxu0 }
 0x138   : > { %v398_v40 = vpack.c.bf16 %v322_v20, %v319_v18 }
 0x139   : > { %v896_v21 = vpop.f32.mrf.mxu0 }
 0x13b   : > { %v335_v22 = vpop.f32.mrf.mxu0 }
 0x13d   : > { %v897_v23 = vpop.f32.mrf.mxu0 }
 0x13e   : > { %v401_v37 = vpack.c.bf16 %v897_v23, %v896_v21 }
 0x13f   : > { %v338_v24 = vpop.f32.mrf.mxu0 }
 0x140   : > { %v400_v38 = vpack.c.bf16 %v338_v24, %v335_v22 }
 0x141   : > { %v900_v25 = vpop.f32.mrf.mxu0 }
 0x143   : > { %v351_v26 = vpop.f32.mrf.mxu0 }
 0x145   : > { %v901_v27 = vpop.f32.mrf.mxu0 }
 0x146   : > { %v403_v35 = vpack.c.bf16 %v901_v27, %v900_v25 }
 0x147   : > { %v354_v28 = vpop.f32.mrf.mxu0 }
 0x148   : > { %v402_v36 = vpack.c.bf16 %v354_v28, %v351_v26 }
 0x149   : > { %v904_v29 = vpop.f32.mrf.mxu0 }
 0x14b   : > { %v367_v30 = vpop.f32.mrf.mxu0 }
 0x14d   : > { %v905_v31 = vpop.f32.mrf.mxu0 }
 0x14e   : > { %v405_v32 = vpack.c.bf16 %v905_v31, %v904_v29 }
 0x14f   : > { %v370_v33 = vpop.f32.mrf.mxu0 }
 0x150   : > { %v404_v34 = vpack.c.bf16 %v370_v33, %v367_v30  ;;  %906 = vmatprep.subr.bf16.mxu1 %v405_v32 }
 0x151   : > { %907 = vmatpush3.bf16.msra.mxu1 %v405_v32 }
 0x152   : > { %908 = vmatprep.subr.bf16.mxu1 %v404_v34 }
 0x155   : > { %909 = vmatpush3.bf16.msra.mxu1 %v404_v34 }
 0x156   : > { %910 = vmatprep.subr.bf16.mxu1 %v403_v35 }
 0x159   : > { %911 = vmatpush3.bf16.msra.mxu1 %v403_v35 }
 0x15a   : > { %912 = vmatprep.subr.bf16.mxu1 %v402_v36 }
 0x15d   : > { %913 = vmatpush3.bf16.msra.mxu1 %v402_v36 }
 0x15e   : > { %914 = vmatprep.subr.bf16.mxu1 %v401_v37 }
 0x161   : > { %915 = vmatpush3.bf16.msra.mxu1 %v401_v37 }
 0x162   : > { %916 = vmatprep.subr.bf16.mxu1 %v400_v38 }
 0x165   : > { %917 = vmatpush3.bf16.msra.mxu1 %v400_v38 }
 0x166   : > { %918 = vmatprep.subr.bf16.mxu1 %v399_v39 }
 0x169   : > { %919 = vmatpush3.bf16.msra.mxu1 %v399_v39 }
 0x16a   : > { %920 = vmatprep.subr.bf16.mxu1 %v398_v40 }
 0x16d   : > { %921 = vmatpush3.bf16.msra.mxu1 %v398_v40 }
 0x170   : > { %923 = vmatmul.mubr.bf16.vlgmr.msra.gmra.mxu1 %v1008_v41 }
 0x171   : > { %926 = vmatprep.mubr.bf16.mxu1 %v1009_v42 }
 0x178   : > { %927 = vmatmul.mubr.bf16.gmra.mxu1 %v1010_v43 }
 0x179   : > { %930 = vmatprep.mubr.bf16.mxu1 %v1011_v44 }
 0x180   : > { %931 = vmatmul.mubr.bf16.gmra.mxu1 %v1012_v45 }
 0x181   : > { %934 = vmatprep.mubr.bf16.mxu1 %v1013_v46 }
 0x188   : > { %935 = vmatmul.mubr.bf16.gmra.mxu1 %v1014_v47 }
 0x230   : > { %v924_v48 = vpop.f32.mrf.mxu1 }
 0x231   : > { %v504_v51 = vadd.f32 %v924_v48, %v750_v49 }
 0x232   : > { %v495_v50 = vpop.f32.mrf.mxu1 }
 0x233   : > { %v496_v53 = vadd.f32 %v750_v49, %v495_v50  ;;  %v560_v56 = vmax.f32 %v504_v51, 0.0 }
 0x234   : > { %v925_v52 = vpop.f32.mrf.mxu1 }
 0x235   : > { %v507_v54 = vadd.f32 %v925_v52, %v750_v49  ;;  %v558_v60 = vmax.f32 %v496_v53, 0.0 }
 0x236   : > { %v498_v55 = vpop.f32.mrf.mxu1 }
 0x237   : > { %v561_v57 = vmax.f32 %v507_v54, 0.0  ;;  %v499_v58 = vadd.f32 %v750_v49, %v498_v55 }
 0x238   : > { %v928_v59 = vpop.f32.mrf.mxu1 }
 0x239   : > { %v803_v61 = vpack.c.bf16 %v561_v57, %v560_v56  ;;  %v559_v62 = vmax.f32 %v499_v58, 0.0  ;;  %v520_v1 = vadd.f32 %v928_v59, %v750_v49 }
 0x23a   : > { %v511_v63 = vpop.f32.mrf.mxu1 }
 0x23b   : > { %835 = vst [vmem:[#allocation3 + $0x8] sm:$0xff] %v803_v61   ;;  %v798_v0 = vpack.c.bf16 %v559_v62, %v558_v60  ;;  %v512_v3 = vadd.f32 %v750_v49, %v511_v63  ;;  %v564_v6 = vmax.f32 %v520_v1, 0.0 }
 0x23c   : > { %v929_v2 = vpop.f32.mrf.mxu1 }
 0x23d   : > { %799 = vst [vmem:[#allocation3] sm:$0xff] %v798_v0   ;;  %v523_v4 = vadd.f32 %v929_v2, %v750_v49  ;;  %v562_v10 = vmax.f32 %v512_v3, 0.0 }
 0x23e   : > { %v514_v5 = vpop.f32.mrf.mxu1 }
 0x23f   : > { %v565_v7 = vmax.f32 %v523_v4, 0.0  ;;  %v515_v8 = vadd.f32 %v750_v49, %v514_v5 }
 0x240   : > { %v932_v9 = vpop.f32.mrf.mxu1 }
 0x241   : > { %v813_v11 = vpack.c.bf16 %v565_v7, %v564_v6  ;;  %v563_v12 = vmax.f32 %v515_v8, 0.0  ;;  %v536_v15 = vadd.f32 %v932_v9, %v750_v49 }
 0x242   : > { %v527_v13 = vpop.f32.mrf.mxu1 }
 0x243   : > { %837 = vst [vmem:[#allocation3 + $0x18] sm:$0xff] %v813_v11   ;;  %v808_v14 = vpack.c.bf16 %v563_v12, %v562_v10  ;;  %v528_v17 = vadd.f32 %v750_v49, %v527_v13  ;;  %v568_v20 = vmax.f32 %v536_v15, 0.0 }
 0x244   : > { %v933_v16 = vpop.f32.mrf.mxu1 }
 0x245   : > { %836 = vst [vmem:[#allocation3 + $0x10] sm:$0xff] %v808_v14   ;;  %v539_v18 = vadd.f32 %v933_v16, %v750_v49  ;;  %v566_v24 = vmax.f32 %v528_v17, 0.0 }
 0x246   : > { %v530_v19 = vpop.f32.mrf.mxu1 }
 0x247   : > { %v569_v21 = vmax.f32 %v539_v18, 0.0  ;;  %v531_v22 = vadd.f32 %v750_v49, %v530_v19 }
 0x248   : > { %v936_v23 = vpop.f32.mrf.mxu1 }
 0x249   : > { %v823_v25 = vpack.c.bf16 %v569_v21, %v568_v20  ;;  %v567_v26 = vmax.f32 %v531_v22, 0.0  ;;  %v552_v29 = vadd.f32 %v936_v23, %v750_v49 }
 0x24a   : > { %v543_v27 = vpop.f32.mrf.mxu1 }
 0x24b   : > { %839 = vst [vmem:[#allocation3 + $0x28] sm:$0xff] %v823_v25   ;;  %v818_v28 = vpack.c.bf16 %v567_v26, %v566_v24  ;;  %v544_v31 = vadd.f32 %v750_v49, %v543_v27  ;;  %v572_v34 = vmax.f32 %v552_v29, 0.0 }
 0x24c   : > { %v937_v30 = vpop.f32.mrf.mxu1 }
 0x24d   : > { %838 = vst [vmem:[#allocation3 + $0x20] sm:$0xff] %v818_v28   ;;  %v555_v32 = vadd.f32 %v937_v30, %v750_v49  ;;  %v570_v37 = vmax.f32 %v544_v31, 0.0 }
 0x24e   : > { %v546_v33 = vpop.f32.mrf.mxu1 }
 0x24f   : > { %v573_v35 = vmax.f32 %v555_v32, 0.0  ;;  %v547_v36 = vadd.f32 %v750_v49, %v546_v33 }
 0x251   : > { %v833_v38 = vpack.c.bf16 %v573_v35, %v572_v34  ;;  %v571_v39 = vmax.f32 %v547_v36, 0.0 }
 0x253   : > { %841 = vst [vmem:[#allocation3 + $0x38] sm:$0xff] %v833_v38   ;;  %v828_v40 = vpack.c.bf16 %v571_v39, %v570_v37 }
 0x255   : > { %840 = vst [vmem:[#allocation3 + $0x30] sm:$0xff] %v828_v40  }
 0x256   : > { %1104 = shalt.err (!%p1101_p5)  }
 0x257   : > { %946 = dma.vmem_to_hbm [thread:$0]  (%p954_p6), %s1292_s8, 1024, %s1368_s4, [#allocation4] }
 0x258   : > { %1144 = dma.done.wait (%p954_p6), [#allocation4], 1024 }
 0x259   : > { %1146 = vsyncadd (%p954_p6), [#allocation4], 4294966272 }
 0x25a PF: > { %p14_p7 = scmp.ge.s32.totalorder %s1215_s20, 3   ;;  %s1383_s15 = smov %s1153_s16 }
 0x25b   : > { %s1384_s16 = smov %s1157_s17  ;;  %s1385_s17 = smov %s1225_s23 }
 0x25c   : > { %s1386_s18 = smov %s1215_s20  ;;  %16 = sbr.rel (!%p14_p7) target bundleno = 3 (0x3), region = 77 }
 0x261   :  { %673 = vsyncpa [#allocation6], 1 }
 0x262   :  { %675 = vsyncpa [#allocation6 + $0x1], 1 }
 0x263   :  { %676 = vsyncmov [#allocation4] }
 0x266   :  { %s677_s19 = vpop.sfrf %676 }
 0x267   :  { %p776_p9 = scmp.ne.s32.totalorder %s677_s19, 0 }
 0x269   :  { %681 = shalt.err (%p776_p9)  }
 0x26a   :  { %683 = vsyncmov [#allocation4 + $0x1] }
 0x26d   :  { %s684_s5 = vpop.sfrf %683 }
 0x26e   :  { %p777_p8 = scmp.ne.s32.totalorder %s684_s5, 0 }
 0x270   :  { %688 = shalt.err (%p777_p8)  }

</bundles_post_ra>
